<compile_context>
chip_gen: v7x
topology: tpu7x:2x2x1
jax: 0.10.0
libtpu: 0.0.40
codegen_flags: <defaults>
</compile_context>

<pallas_src>
import jax
import jax.numpy as jnp
from jax import lax
from jax.experimental import pallas as pl
from jax.experimental.pallas import tpu as pltpu


def _cdiv(a, b):
    return -(-a // b)


def _round_up(x, m):
    return ((x + m - 1) // m) * m


def _round_down_multiple(x, m):
    return max(m, (x // m) * m)


def _largest_divisor(total, upper, multiple):
    """Largest divisor of `total` that is <= upper and a multiple of `multiple`."""
    cand = (min(upper, total) // multiple) * multiple
    while cand >= multiple:
        if total % cand == 0:
            return cand
        cand -= multiple
    return None


def _vmem_capacity_bytes():
    try:
        return int(pltpu.get_tpu_info().vmem_capacity_bytes)
    except Exception:
        return 64 * 1024 * 1024  # conservative fallback: v7x per-TC VMEM


def _make_lora_kernel(mxu_dtype, k_tile, num_k):
    def kernel(alpha_ref, x_ref, at_ref, b_ref, o_ref, acc_ref):
        k = pl.program_id(2)

        @pl.when(k == 0)
        def _init():
            acc_ref[...] = jnp.zeros_like(acc_ref)

        # First matmul: x tile (tb, tk) contracted with the VMEM-resident
        # A^T (rank, in_dim) sliced to (rank, tk)  ->  (tb, rank), f32 acc.
        x = x_ref[...]
        if num_k == 1:
            a_t = at_ref[...]
        else:
            start = k * k_tile
            if k_tile % 128 == 0:
                start = pl.multiple_of(start, 128)
            a_t = at_ref[:, pl.ds(start, k_tile)]
        if mxu_dtype is not None:
            x = x.astype(mxu_dtype)
            a_t = a_t.astype(mxu_dtype)
        acc_ref[...] += lax.dot_general(
            x, a_t,
            dimension_numbers=(((1,), (1,)), ((), ())),
            preferred_element_type=jnp.float32)

        @pl.when(k == num_k - 1)
        def _finalize():
            # Fold alpha into the tiny (tb, rank) intermediate instead of the
            # (tb, out_tile) result: out_dim/rank times fewer VPU multiplies.
            alpha = alpha_ref[0]
            xa = acc_ref[...] * alpha
            b = b_ref[...]
            if mxu_dtype is not None:
                xa = xa.astype(mxu_dtype)
                b = b.astype(mxu_dtype)
            else:
                xa = xa.astype(b.dtype)
            o_ref[...] = jnp.dot(
                xa, b, preferred_element_type=jnp.float32
            ).astype(o_ref.dtype)

    return kernel


def lora_forward(x, A, B, alpha, *, batch_tile=None, k_tile=None,
                 out_tile=None, mxu_dtype=None):
    """alpha * (x @ A @ B) as a Pallas TPU kernel.

    x: (batch, in_dim), A: (in_dim, rank), B: (rank, out_dim).
    mxu_dtype=None (default) keeps the native input dtype on the MXU with f32
    accumulation (exact parity for f32 inputs); pass jnp.bfloat16 to force
    bf16 MXU operands for f32 inputs.
    """
    batch, in_dim = x.shape
    in_dim_a, rank = A.shape
    rank_b, out_dim = B.shape
    assert in_dim == in_dim_a and rank == rank_b

    x_isz = jnp.dtype(x.dtype).itemsize
    w_isz = jnp.dtype(A.dtype).itemsize
    granule = max(8, 32 // x_isz)            # sublane granule: 8 f32 / 16 bf16 / 32 int8
    rank_sl = _round_up(rank, 8)
    rank_ln = _round_up(rank, 128)

    # Generation-aware VMEM budgeting.
    capacity = _vmem_capacity_bytes()
    budget = (capacity * 3) // 5             # ~60% of physical for tiling math
    limit_cap = (capacity * 17) // 20        # ~85% of physical as scoped limit

    def vmem_estimate(tb, kt, ot):
        x_buf = 2 * tb * kt * x_isz                               # double-buffered x
        o_buf = 2 * tb * ot * x_isz                               # double-buffered out
        at_buf = 2 * rank_sl * _round_up(in_dim, 128) * w_isz     # resident A^T
        b_buf = 2 * rank_sl * _round_up(ot, 128) * w_isz          # B tile
        acc = tb * rank_ln * 4                                    # f32 accumulator
        return x_buf + o_buf + at_buf + b_buf + acc

    # --- batch tile: fixed multiple of the sublane granule; cdiv grid -------
    if batch_tile is None:
        if batch <= granule:
            batch_tile = batch                 # == full dim -> always legal
        else:
            batch_tile = min(_round_up(batch, granule), 512)

    # --- out_dim tile: only when the output tile would squeeze VMEM ---------
    if out_tile is None:
        if out_dim <= 128 or 2 * batch_tile * out_dim * x_isz <= budget // 3:
            out_tile = out_dim
        else:
            out_tile = max(128, _round_down_multiple(
                (budget // 3) // (2 * batch_tile * x_isz), 128))
            out_tile = min(out_tile, _round_up(out_dim, 128))

    # --- reduction (in_dim) tile: split before shrinking the batch tile -----
    if k_tile is None:
        if 2 * batch_tile * in_dim * x_isz <= budget // 3:
            k_tile = in_dim
        else:
            want = max(1024, (budget // 3) // (2 * batch_tile * x_isz))
            k_tile = _largest_divisor(in_dim, want, 128) or in_dim
    assert k_tile == in_dim or (in_dim % k_tile == 0 and k_tile % 128 == 0), \
        "k_tile must divide in_dim and be a multiple of 128"
    num_k = in_dim // k_tile

    # --- shrink batch tile only if the estimate still exceeds the budget ----
    while (batch_tile > granule
           and vmem_estimate(batch_tile, k_tile, out_tile) > budget):
        batch_tile = _round_down_multiple(batch_tile // 2, granule)

    # --- v7x megacore: keep >= 2 parallel grid steps when possible ----------
    nb = _cdiv(batch, batch_tile)
    nj = _cdiv(out_dim, out_tile)
    if nb * nj == 1 and batch > granule:
        batch_tile = min(batch_tile, _round_up(_cdiv(batch, 2), granule))
        nb = _cdiv(batch, batch_tile)

    grid = (nb, nj, num_k)

    vmem_limit = int(min(
        limit_cap,
        max(32 * 1024 * 1024,
            int(vmem_estimate(batch_tile, k_tile, out_tile) * 1.25))))

    # alpha as a (1,) SMEM scalar: no closure -> no recompile per alpha value.
    alpha_arr = jnp.asarray(alpha, dtype=jnp.float32).reshape((1,))
    # One-time tiny transpose: rank lands on sublanes, in_dim on lanes.
    A_T = A.T

    cost = pl.CostEstimate(
        flops=2 * batch * rank * (in_dim * nj + out_dim),
        transcendentals=0,
        bytes_accessed=(batch * in_dim + batch * out_dim) * x_isz
        + (in_dim * rank + rank * out_dim) * w_isz,
    )

    return pl.pallas_call(
        _make_lora_kernel(mxu_dtype, k_tile, num_k),
        out_shape=jax.ShapeDtypeStruct((batch, out_dim), x.dtype),
        grid_spec=pltpu.PrefetchScalarGridSpec(
            num_scalar_prefetch=0,
            grid=grid,
            in_specs=[
                # alpha: whole (1,) array in SMEM.
                pl.BlockSpec(memory_space=pltpu.MemorySpace.SMEM),
                # x: tile batch (parallel) and in_dim (reduction).
                pl.BlockSpec((batch_tile, k_tile), lambda i, j, k: (i, k)),
                # A^T: fully VMEM-resident, DMA'd once (constant block index).
                pl.BlockSpec((rank, in_dim), lambda i, j, k: (0, 0)),
                # B: blocked along out_dim (parallel axis), rank on sublanes.
                pl.BlockSpec((rank, out_tile), lambda i, j, k: (0, j)),
            ],
            # Same output block across k -> resident accumulator tile.
            out_specs=pl.BlockSpec((batch_tile, out_tile),
                                   lambda i, j, k: (i, j)),
            scratch_shapes=[pltpu.VMEM((batch_tile, rank), jnp.float32)],
        ),
        compiler_params=pltpu.CompilerParams(
            dimension_semantics=("parallel", "parallel", "arbitrary"),
            vmem_limit_bytes=vmem_limit,
        ),
        cost_estimate=cost,
    )(alpha_arr, x, A_T, B)


def lora_ref(x, A, B, alpha):
    return alpha * (x @ A @ B)


if __name__ == "__main__":
    # Deterministic parameters mirroring the PyTorch module's __init__:
    #   A = randn(in_dim, rank) / sqrt(rank),  B = zeros(rank, out_dim)
    batch, in_dim, rank, out_dim = 8, 32, 4, 64
    alpha = 2.0

    key = jax.random.PRNGKey(0)
    kx, ka, kb = jax.random.split(key, 3)

    x = jax.random.normal(kx, (batch, in_dim), dtype=jnp.float32)
    std_dev = 1.0 / jnp.sqrt(jnp.float32(rank))
    A = jax.random.normal(ka, (in_dim, rank), dtype=jnp.float32) * std_dev
    B_init = jnp.zeros((rank, out_dim), dtype=jnp.float32)   # as in __init__
    B = jax.random.normal(kb, (rank, out_dim), dtype=jnp.float32)

    # 1) Freshly initialised module (B == 0): output must be zero.
    out0 = lora_forward(x, A, B_init, alpha)
    jax.block_until_ready(out0)
    assert jnp.allclose(out0, lora_ref(x, A, B_init, alpha), atol=1e-6)

    # 2) Native f32 path vs. reference (exact semantics of the module).
    out1 = lora_forward(x, A, B, alpha)
    jax.block_until_ready(out1)
    assert jnp.allclose(out1, lora_ref(x, A, B, alpha), rtol=1e-5, atol=1e-4)

    # 3) cdiv batch tiling path (batch not a multiple of the sublane granule).
    x2 = jax.random.normal(kx, (10, in_dim), dtype=jnp.float32)
    out2 = lora_forward(x2, A, B, alpha)
    jax.block_until_ready(out2)
    assert jnp.allclose(out2, lora_ref(x2, A, B, alpha), rtol=1e-5, atol=1e-4)

    # 4) bf16 activations end-to-end; scale-aware tolerance (bf16 ~8-bit mantissa).
    xb, Ab, Bb = (t.astype(jnp.bfloat16) for t in (x, A, B))
    out3 = lora_forward(xb, Ab, Bb, alpha)
    jax.block_until_ready(out3)
    ref = lora_ref(x, A, B, alpha)
    err = float(jnp.max(jnp.abs(out3.astype(jnp.float32) - ref)))
    scale = float(jnp.max(jnp.abs(ref)))
    assert err <= 0.04 * scale + 0.1, (err, scale)

    print("KERNEL_OK")
</pallas_src>

<mosaic_0001>
module attributes {stable_mosaic.version = 11 : i64} {
  func.func @kernel(%arg0: i32, %arg1: i32, %arg2: i32, %arg3: memref<1xf32, #tpu.memory_space<smem>>, %arg4: memref<8x32xf32, #tpu.memory_space<vmem>>, %arg5: memref<4x32xf32, #tpu.memory_space<vmem>>, %arg6: memref<4x64xf32, #tpu.memory_space<vmem>>, %arg7: memref<8x64xf32, #tpu.memory_space<vmem>>, %arg8: memref<8x4xf32, #tpu.memory_space<vmem>>) attributes {dimension_semantics = [#tpu.dimension_semantics<parallel>, #tpu.dimension_semantics<parallel>, #tpu.dimension_semantics<arbitrary>], iteration_bounds = array<i64: 1, 1, 1>, scalar_prefetch = 0 : i64, scratch_operands = 1 : i64, tpu.core_type = #tpu.core_type<tc>, window_params = [{transform_indices = @transform_0, window_bounds = array<i64: 1>}, {transform_indices = @transform_1, window_bounds = array<i64: 8, 32>}, {pipeline_mode = #tpu.pipeline_mode<synchronous>, transform_indices = @transform_2, window_bounds = array<i64: 4, 32>}, {transform_indices = @transform_3, window_bounds = array<i64: 4, 64>}, {transform_indices = @transform_4, window_bounds = array<i64: 8, 64>}]} {
    %c0_i32 = arith.constant 0 : i32
    %0 = arith.cmpi eq, %arg2, %c0_i32 : i32
    %1 = arith.extui %0 : i1 to i32
    %c0_i32_0 = arith.constant 0 : i32
    %2 = arith.cmpi ne, %1, %c0_i32_0 : i32
    scf.if %2 {
      %cst_10 = arith.constant 0.000000e+00 : f32
      %12 = vector.broadcast %cst_10 : f32 to vector<8x4xf32>
      %c0_11 = arith.constant 0 : index
      %c0_12 = arith.constant 0 : index
      %13 = vector.load %arg8[%c0_11, %c0_12] : memref<8x4xf32, #tpu.memory_space<vmem>>, vector<8x4xf32>
      tpu.vector_store %arg8[%c0_11, %c0_12], %12 {strides = array<i32>} : memref<8x4xf32, #tpu.memory_space<vmem>>, vector<8x4xf32>,
    } else {
    }
    %c0 = arith.constant 0 : index
    %c0_1 = arith.constant 0 : index
    %3 = vector.load %arg4[%c0, %c0_1] : memref<8x32xf32, #tpu.memory_space<vmem>>, vector<8x32xf32>
    %c0_2 = arith.constant 0 : index
    %c0_3 = arith.constant 0 : index
    %4 = vector.load %arg5[%c0_2, %c0_3] : memref<4x32xf32, #tpu.memory_space<vmem>>, vector<4x32xf32>
    %c0_4 = arith.constant 0 : index
    %c0_5 = arith.constant 0 : index
    %5 = vector.load %arg8[%c0_4, %c0_5] : memref<8x4xf32, #tpu.memory_space<vmem>>, vector<8x4xf32>
    %cst = arith.constant dense<0.000000e+00> : vector<8x4xf32>
    %6 = tpu.matmul %3, %4, %cst {dimension_numbers = #tpu.dot_dimension_numbers<[1], [1], [0], [0], [0, 0, 1, 0], [], []>} : vector<8x32xf32>, vector<4x32xf32>, vector<8x4xf32> -> vector<8x4xf32>
    %7 = arith.addf %5, %6 : vector<8x4xf32>
    %c0_6 = arith.constant 0 : index
    %c0_7 = arith.constant 0 : index
    %8 = vector.load %arg8[%c0_6, %c0_7] : memref<8x4xf32, #tpu.memory_space<vmem>>, vector<8x4xf32>
    tpu.vector_store %arg8[%c0_6, %c0_7], %7 {strides = array<i32>} : memref<8x4xf32, #tpu.memory_space<vmem>>, vector<8x4xf32>,
    %c0_i32_8 = arith.constant 0 : i32
    %9 = arith.cmpi eq, %arg2, %c0_i32_8 : i32
    %10 = arith.extui %9 : i1 to i32
    %c0_i32_9 = arith.constant 0 : i32
    %11 = arith.cmpi ne, %10, %c0_i32_9 : i32
    scf.if %11 {
      %c0_10 = arith.constant 0 : index
      %12 = memref.load %arg3[%c0_10] : memref<1xf32, #tpu.memory_space<smem>>
      %c0_11 = arith.constant 0 : index
      %c0_12 = arith.constant 0 : index
      %13 = vector.load %arg8[%c0_11, %c0_12] : memref<8x4xf32, #tpu.memory_space<vmem>>, vector<8x4xf32>
      %14 = vector.broadcast %12 : f32 to vector<8x4xf32>
      %15 = arith.mulf %13, %14 : vector<8x4xf32>
      %c0_13 = arith.constant 0 : index
      %c0_14 = arith.constant 0 : index
      %16 = vector.load %arg6[%c0_13, %c0_14] : memref<4x64xf32, #tpu.memory_space<vmem>>, vector<4x64xf32>
      %cst_15 = arith.constant dense<0.000000e+00> : vector<8x64xf32>
      %17 = tpu.matmul %15, %16, %cst_15 {dimension_numbers = #tpu.dot_dimension_numbers<[1], [0], [0], [1], [0, 0, 1, 1], [], []>} : vector<8x4xf32>, vector<4x64xf32>, vector<8x64xf32> -> vector<8x64xf32>
      %c0_16 = arith.constant 0 : index
      %c0_17 = arith.constant 0 : index
      %18 = vector.load %arg7[%c0_16, %c0_17] : memref<8x64xf32, #tpu.memory_space<vmem>>, vector<8x64xf32>
      tpu.vector_store %arg7[%c0_16, %c0_17], %17 {strides = array<i32>} : memref<8x64xf32, #tpu.memory_space<vmem>>, vector<8x64xf32>,
    } else {
    }
    return
  }
  func.func @transform_0(%arg0: i32, %arg1: i32, %arg2: i32) -> i32 {
    %c0_i32 = arith.constant 0 : i32
    %c0_i32_0 = arith.constant 0 : i32
    return %c0_i32 : i32
  }
  func.func @transform_1(%arg0: i32, %arg1: i32, %arg2: i32) -> (i32, i32) {
    %c0_i32 = arith.constant 0 : i32
    return %arg0, %arg2 : i32, i32
  }
  func.func @transform_2(%arg0: i32, %arg1: i32, %arg2: i32) -> (i32, i32) {
    %c0_i32 = arith.constant 0 : i32
    %c0_i32_0 = arith.constant 0 : i32
    %c0_i32_1 = arith.constant 0 : i32
    return %c0_i32, %c0_i32_0 : i32, i32
  }
  func.func @transform_3(%arg0: i32, %arg1: i32, %arg2: i32) -> (i32, i32) {
    %c0_i32 = arith.constant 0 : i32
    %c0_i32_0 = arith.constant 0 : i32
    return %c0_i32, %arg1 : i32, i32
  }
  func.func @transform_4(%arg0: i32, %arg1: i32, %arg2: i32) -> (i32, i32) {
    %c0_i32 = arith.constant 0 : i32
    return %arg0, %arg1 : i32, i32
  }
}

</mosaic_0001>

<bundles_post_ra>
// kernel: tpu_custom_call.1
= control target key start
LH: loop header
LB: loop body
LE: loop exit
PB: predicated region body
PF: predicated region fallthrough
CT: control target
= control target key end

     0   :  { %10 = vsyncpa [#allocation5], 0  ;;  %s357_s0 = inlined_call_operand.<no memory space> [shape: f32[1], index: 0, kind: input, shape index: {}]   ;;  %s358_s1 = inlined_call_operand.hbm [shape: f32[8,32], index: 1, kind: input, shape index: {}]   ;;  %s359_s2 = inlined_call_operand.vmem [shape: f32[4,32], index: 2, kind: input, shape index: {}]   ;;  %s360_s3 = inlined_call_operand.vmem [shape: f32[4,64], index: 3, kind: input, shape index: {}]   ;;  %s361_s4 = inlined_call_operand.hbm [shape: f32[8,64], index: 4, kind: output, shape index: {}]  }
   0x1   :  { %11 = vsyncpa [#allocation6], 0  ;;  %s292_s15 = smov [#allocation4]   ;;  %s244_s19 = scalar_lea.hbm %s358_s1, 128 }
   0x2   :  { %s20_s16 = sshll.u32 %s292_s15, 4  ;;  %p245_p0 = scmp.ne.s32.totalorder %s358_s1, %s244_s19  ;;  %s21_s16 = int_to_ptr.vmem [resolvable:$true] %s20_s16 }
   0x3   :  { %p248_p1 = scmp.lt.u32.totalorder %s244_s19, %s358_s1 }
   0x5   :  { %p250_p2 = pnand %p248_p1, %p245_p0 }
   0x7   :  { %253 = shalt.err (!%p250_p2)
}
   0x8   :  { %s254_s24 = scalar_lea.vmem %s21_s16, 128  ;;  %p259_p4 = scmp.lt.s32.totalorder %s21_s16, %s21_s16 }
   0x9   :  { %p255_p3 = scmp.ne.s32.totalorder %s21_s16, %s254_s24  ;;  %p260_p5 = scmp.lt.s32.totalorder %s254_s24, %s254_s24 }
   0xb   :  { %p261_p6 = por %p260_p5, %p259_p4 }
   0xd   :  { %p262_p7 = pnand %p261_p6, %p255_p3 }
   0xf   :  { %265 = shalt.err (!%p262_p7)
}
  0x10   :  { %23 = dma.hbm_to_vmem [thread:$0]  %s358_s1, 128, %s21_s16, [#allocation5]  }
  0x11   :  { %288 = dma.done.wait [#allocation5], 128  }
  0x12   :  { %289 = vsyncadd [#allocation5], 4294967168  ;;  %vm35_vm0 = vcmask 31744   ;;  %v293_v0 = vmov 0.0   ;;  %vm294_vm1 = vmmov 0   ;;  %vm40_vm2 = vcmask 261120  }
  0x13   :  { %230 = vmatprep.subr.mxu0 %v293_v0  ;;  %232 = vmatprep.mubr.msk.f32.mxu0 %vm294_vm1, %v293_v0  ;;  %36 = vst.msk [vmem:[#allocation2] sm:$0xff] %vm35_vm0, %v293_v0  ;;  %v38_v1 = vld [vmem:[%s359_s2] sm:$0xf]  ;;  %v37_v2 = vld [vmem:[#allocation4] sm:$0xff]  ;;  %vm131_vm3 = vcmask 1043456   ;;  %v125_v8 = vstv %s357_s0  ;;  %s295_s2 = smov [#allocation7]  }
  0x14   :  { %235 = vmatprep.subr.mxu1 %v293_v0  ;;  %237 = vmatprep.mubr.msk.f32.mxu1 %vm294_vm1, %v293_v0  ;;  %v127_v3 = vld [vmem:[%s360_s3] sm:$0xf]  ;;  %s213_s6 = sshll.u32 %s295_s2, 4  ;;  %vm205_vm4 = vcmask 523264   ;;  %s214_s6 = int_to_ptr.vmem [resolvable:$true] %s213_s6 }
  0x15   :  { %231 = vmatpush3.xpose.msk.msra.mxu0 %vm40_vm2, %v38_v1  ;;  %236 = vmatpush3.msk.msra.mxu1 %vm131_vm3, %v127_v3  ;;  %s266_s3 = scalar_lea.vmem %s214_s6, 128  ;;  %p271_p9 = scmp.lt.s32.totalorder %s214_s6, %s214_s6 }
  0x16   :  { %p267_p8 = scmp.ne.s32.totalorder %s214_s6, %s266_s3  ;;  %p272_p10 = scmp.lt.s32.totalorder %s266_s3, %s266_s3 }
  0x18   :  { %233 = vmatmul.mubr.msk.f32.vlgmr.msra.gmra.mrb[0].mxu0 %vm40_vm2, %v37_v2  ;;  %p273_p11 = por %p272_p10, %p271_p9 }
  0x1a   :  { %v39_v4 = vld [vmem:[#allocation2] sm:$0xff]  ;;  %p274_p12 = pnand %p273_p11, %p267_p8 }
  0xeb   :  { %v113_v5 = vpop.f32.mrb[0].mxu0 }
  0xec   :  { %v117_v6 = vadd.f32 %v113_v5, %v39_v4  ;;  %v234_v7 = vpop.f32.mrb[1].mxu0 }
  0xee   :  { %119 = vst.msk [vmem:[#allocation2] sm:$0xff] %vm35_vm0, %v117_v6 }
  0xf5   :  { %v124_v9 = vld [vmem:[#allocation2] sm:$0xff] }
  0xf6   :  { %v126_v10 = vmul.f32 %v125_v8, %v124_v9 }
  0xf8   :  { %238 = vmatmul.mubr.msk.f32.vlgmr.msra.gmra.mrb[0].mxu1 %vm35_vm0, %v126_v10 }
 0x1cb   :  { %v201_v11 = vpop.f32.mrb[0].mxu1 }
 0x1cc   :  { %v239_v12 = vpop.f32.mrb[1].mxu1  ;;  %206 = vst.msk [vmem:[#allocation7] sm:$0xff] %vm205_vm4, %v201_v11 }
 0x1cd   :  { %277 = shalt.err (!%p274_p12)
}
 0x1ce   :  { %s278_s8 = scalar_lea.hbm %s361_s4, 128 }
 0x1cf   :  { %p279_p13 = scmp.ne.s32.totalorder %s361_s4, %s278_s8  ;;  %p282_p0 = scmp.lt.u32.totalorder %s278_s8, %s361_s4 }
 0x1d1   :  { %p284_p1 = pnand %p282_p0, %p279_p13 }
 0x1d3   :  { %287 = shalt.err (!%p284_p1)
}
 0x1d4   :  { %216 = dma.vmem_to_hbm [thread:$0]  %s214_s6, 128, %s361_s4, [#allocation6]  }
 0x1d5   :  { %290 = dma.done.wait [#allocation6], 128  }
 0x1d6   :  { %291 = vsyncadd [#allocation6], 4294967168 }
 0x1d7   :  { %220 = vsyncpa [#allocation5], 1 }
 0x1d8   :  { %221 = vsyncpa [#allocation6], 1 }

</bundles_post_ra>
